<compile_context>
chip_gen: v5e
topology: v5e:2x2
jax: 0.10.0
libtpu: 0.0.40
codegen_flags: <defaults>
</compile_context>

<pallas_src>
import jax
import jax.numpy as jnp
from jax.experimental import pallas as pl
from jax.experimental.pallas import tpu as pltpu


def _pad_up(v, m):
    return -(-v // m) * m


def _vmem_capacity_bytes():
    """Per-core VMEM capacity, with a conservative (v7x) fallback."""
    try:
        info = pltpu.get_tpu_info()
        cap = getattr(info, "vmem_capacity_bytes", None)
        if cap:
            return int(cap)
    except Exception:
        pass
    return 64 << 20


def _decoder_block_kernel(x_ref, w_ref, b_ref, o_ref):
    # x_ref: (1, Cin, L)   activations, lane axis = chunk of flattened H*W
    # w_ref: (Pb, Cin)     chunk of W_t, rows ordered (co, kh, kw)
    # b_ref: (Pb, 1)       f32 bias column, broadcast over lanes
    # o_ref: (1, Pb, L)
    #
    # NOTE on masked tails: when HW % L != 0 the padded lanes of the last tile
    # carry garbage.  That is safe here because the math is purely elementwise
    # / per-lane (no reduction along L) and the store is masked by Pallas.  Do
    # not add any cross-lane reduction along L without guarding those lanes.
    x = x_ref[0]                       # (Cin, L)
    w = w_ref[...]                     # (Pb, Cin)
    b = b_ref[...]                     # (Pb, 1) f32
    cin = w.shape[1]

    # Small contractions are cheaper as Cin broadcast-FMAs on the VPU than a
    # K<=16 MXU matmul (which uses <25% of the MXU rows and pays push/pop
    # latency).  bf16 keeps the lower threshold so v5e (no bf16 VPU) prefers
    # the MXU and avoids per-row f32 cast traffic.
    fma_limit = 8 if x.dtype == jnp.bfloat16 else 16

    if cin <= fma_limit:
        xf = x.astype(jnp.float32)     # casts hoisted out of the ci loop
        wf = w.astype(jnp.float32)
        # Fold the bias into the first FMA (no zero-init + trailing add).
        # The (Pb,1) / (1,L) operand broadcasts are handled by Mosaic's
        # replicated layouts, so no explicit broadcast ops per ci.
        acc = wf[:, 0:1] * xf[0:1, :] + b
        for ci in range(1, cin):       # static unroll; cin is compile-time
            acc = acc + wf[:, ci:ci + 1] * xf[ci:ci + 1, :]
    else:
        # MXU path for larger Cin, f32 accumulator.  Default MXU matmul
        # precision for f32 operands is not pinned here; see the loose test
        # tolerance for this branch.
        acc = jnp.dot(w, x, preferred_element_type=jnp.float32) + b

    # LeakyReLU(0.01) epilogue: max(y, 0.01*y) -> 1 mul + 1 max on the VPU.
    o_ref[0] = jnp.maximum(acc, jnp.float32(0.01) * acc).astype(o_ref.dtype)


def decoder_block(x_nchw, weight, bias, *, vmem_block_budget_bytes=None):
    """x_nchw: (N, Cin, H, W); weight: (Cin, Cout, 2, 2) (PyTorch ConvTranspose2d
    layout); bias: (Cout,). Returns (N, Cout, 2H, 2W) in NCHW, matching
    DecoderBlock.forward (ConvTranspose2d(k=2, s=2) + LeakyReLU(0.01))."""
    N, Cin, H, W = x_nchw.shape
    Cin_w, Cout, kH, kW = weight.shape
    assert Cin == Cin_w and kH == 2 and kW == 2, "module spec is k=2, s=2"

    HW = H * W
    P = Cout * 4
    dtype = x_nchw.dtype
    itemsize = jnp.dtype(dtype).itemsize

    # ---- free / tiny relayouts of the operands ------------------------------
    x3 = x_nchw.reshape(N, Cin, HW)                 # zero-cost view of NCHW
    # w_t[co*4 + kh*2 + kw, ci] = weight[ci, co, kh, kw]   (tiny tensor)
    w_t = weight.reshape(Cin, P).T.astype(dtype)
    # bias expanded to the (co, kh, kw) row order, single f32 column
    b_col = jnp.repeat(bias.astype(jnp.float32), 4).reshape(P, 1)

    # ---- generation-aware VMEM budgeting ------------------------------------
    cap = _vmem_capacity_bytes()                    # 128 MiB v5e/v6e, 64 MiB v7x
    usable = (cap * 3) // 4                         # headroom for Mosaic scratch
    if vmem_block_budget_bytes is None:
        vmem_block_budget_bytes = max(4 << 20, min(16 << 20, usable // 3))

    # ---- block P for big-channel layers so lanes stay wide ------------------
    Pb = 256 if P >= 512 else P
    n_pb = pl.cdiv(P, Pb)

    # ---- lane-chunk size L (includes 2x double-buffer + 8-sublane padding) --
    per_lane = 2 * (_pad_up(Cin, 8) + _pad_up(Pb, 8)) * itemsize
    l_cap = max(128, (vmem_block_budget_bytes // per_lane) // 128 * 128)
    L = HW if HW <= l_cap else l_cap                # full extent or 128-multiple
    grid_l = pl.cdiv(HW, L)

    # Megacore: prefer an even total step count so both v7x TensorCores stay
    # busy on this fully "parallel" grid.
    if (N * n_pb * grid_l) % 2 == 1 and HW > 128:
        cand_L = max(128, min(_pad_up(pl.cdiv(HW, grid_l + 1), 128), L))
        cand_gl = pl.cdiv(HW, cand_L)
        if (N * n_pb * cand_gl) % 2 == 0:
            L, grid_l = cand_L, cand_gl

    # Explicit scoped-VMEM limit covering the real resident footprint
    # (2x double-buffered activation blocks + 2x the small weight/bias blocks).
    blk_bytes = (2 * (_pad_up(Cin, 8) + _pad_up(Pb, 8)) * _pad_up(L, 128) * itemsize
                 + 2 * _pad_up(Pb, 8) * (_pad_up(Cin, 128) * itemsize + 128 * 4))
    vmem_limit = int(min(max(blk_bytes * 5 // 4 + (2 << 20), 32 << 20), usable))

    cost = pl.CostEstimate(
        flops=2 * N * HW * Cin * P + 2 * N * HW * P,
        transcendentals=0,
        bytes_accessed=(N * Cin * HW + N * P * HW + P * Cin) * itemsize + P * 4,
    )

    y = pl.pallas_call(
        _decoder_block_kernel,
        out_shape=jax.ShapeDtypeStruct((N, P, HW), dtype),
        grid_spec=pltpu.PrefetchScalarGridSpec(
            num_scalar_prefetch=0,
            grid=(N, n_pb, grid_l),
            in_specs=[
                pl.BlockSpec((1, Cin, L), lambda n, p, l: (n, 0, l)),
                pl.BlockSpec((Pb, Cin), lambda n, p, l: (p, 0)),
                pl.BlockSpec((Pb, 1), lambda n, p, l: (p, 0)),
            ],
            out_specs=pl.BlockSpec((1, Pb, L), lambda n, p, l: (n, p, l)),
        ),
        compiler_params=pltpu.CompilerParams(
            dimension_semantics=("parallel", "parallel", "parallel"),
            vmem_limit_bytes=vmem_limit),
        cost_estimate=cost,
    )(x3, w_t, b_col)

    # ---- output scatter: (N, Cout*4, H*W) -> NCHW (N, Cout, 2H, 2W) ---------
    # TODO(synk): kept as one XLA transpose (extra HBM round trip of the
    # output); see header — in-kernel NCHW writes need a lane interleave that
    # Mosaic does not lower robustly for f32 today.
    y = y.reshape(N, Cout, 2, 2, H, W)
    y = jnp.transpose(y, (0, 1, 4, 2, 5, 3)).reshape(N, Cout, 2 * H, 2 * W)
    return y


def _reference(x_nchw, weight, bias):
    # Pure-JAX reference of ConvTranspose2d(k=2, s=2) + LeakyReLU(0.01), in f32.
    xf = x_nchw.astype(jnp.float32)
    wf = weight.astype(jnp.float32)
    N, Cin, H, W = x_nchw.shape
    _, Cout, _, _ = weight.shape
    y = jnp.einsum('nihw,iojk->nohjwk', xf, wf,
                   precision=jax.lax.Precision.HIGHEST)
    y = y.reshape(N, Cout, 2 * H, 2 * W) + bias.astype(jnp.float32)[None, :, None, None]
    return jnp.where(y > 0, y, 0.01 * y)


if __name__ == "__main__":
    key = jax.random.PRNGKey(0)

    def make_case(k, N, Cin, Cout, H, W, dtype):
        kx, kw, kb = jax.random.split(k, 3)
        x = jax.random.normal(kx, (N, Cin, H, W), dtype=jnp.float32).astype(dtype)
        scale = 1.0 / jnp.sqrt(jnp.float32(Cin * 2 * 2))
        w = (scale * jax.random.normal(kw, (Cin, Cout, 2, 2), jnp.float32)).astype(dtype)
        b = scale * jax.random.normal(kb, (Cout,), jnp.float32)
        return x, w, b

    # (name, N, Cin, Cout, H, W, dtype, tol, kwargs)
    cases = [
        # primary case (matches the module's intended small shapes): VPU-FMA path
        ("fma_f32",    2,  4,   8, 16, 16, jnp.float32,  1e-5, {}),
        # Cin > 16 -> MXU jnp.dot path (correctness-review concern).  Loose
        # tolerance: in-kernel f32 matmul precision is the MXU default, not
        # pinned to HIGHEST; real bugs would give O(1) errors.
        ("mxu_f32",    2, 32,  16,  8,  8, jnp.float32,  2e-2, {}),
        # force a tiny lane budget -> multi-step L grid with a masked tail
        ("tiled_tail", 2,  4,   8, 12, 20, jnp.float32,  1e-5,
         {"vmem_block_budget_bytes": 1 << 16}),
        # P >= 512 -> the P-blocking grid axis (Pb = 256, n_pb = 2)
        ("p_blocked",  1,  8, 128,  8,  8, jnp.float32,  1e-5, {}),
        # bf16 activations/weights (lower FMA threshold, bf16 stores)
        ("fma_bf16",   2,  3,   5, 12, 12, jnp.bfloat16, 2e-2, {}),
    ]

    for name, N, Cin, Cout, H, W, dtype, tol, kwargs in cases:
        key, sub = jax.random.split(key)
        x, w, b = make_case(sub, N, Cin, Cout, H, W, dtype)
        out = jax.block_until_ready(decoder_block(x, w, b, **kwargs))
        ref = _reference(x, w, b)
        assert out.shape == (N, Cout, 2 * H, 2 * W), f"{name}: bad shape {out.shape}"
        ok = jnp.allclose(out.astype(jnp.float32), ref, atol=tol, rtol=tol)
        assert bool(ok), f"{name}: mismatch vs reference"

    print("KERNEL_OK")
</pallas_src>

<mosaic_0001>
module attributes {stable_mosaic.version = 11 : i64} {
  func.func @_decoder_block_kernel(%arg0: i32, %arg1: i32, %arg2: i32, %arg3: memref<1x4x256xf32, #tpu.memory_space<vmem>>, %arg4: memref<32x4xf32, #tpu.memory_space<vmem>>, %arg5: memref<32x1xf32, #tpu.memory_space<vmem>>, %arg6: memref<1x32x256xf32, #tpu.memory_space<vmem>>) attributes {dimension_semantics = [#tpu.dimension_semantics<parallel>, #tpu.dimension_semantics<parallel>, #tpu.dimension_semantics<parallel>], iteration_bounds = array<i64: 2, 1, 1>, scalar_prefetch = 0 : i64, scratch_operands = 0 : i64, tpu.core_type = #tpu.core_type<tc>, window_params = [{transform_indices = @transform_0, window_bounds = array<i64: 1, 4, 256>}, {transform_indices = @transform_1, window_bounds = array<i64: 32, 4>}, {transform_indices = @transform_2, window_bounds = array<i64: 32, 1>}, {transform_indices = @transform_3, window_bounds = array<i64: 1, 32, 256>}]} {
    %c0 = arith.constant 0 : index
    %c0_0 = arith.constant 0 : index
    %c0_1 = arith.constant 0 : index
    %0 = vector.load %arg3[%c0, %c0_0, %c0_1] : memref<1x4x256xf32, #tpu.memory_space<vmem>>, vector<1x4x256xf32>
    %1 = vector.shape_cast %0 : vector<1x4x256xf32> to vector<4x256xf32>
    %c0_2 = arith.constant 0 : index
    %c0_3 = arith.constant 0 : index
    %2 = vector.load %arg4[%c0_2, %c0_3] : memref<32x4xf32, #tpu.memory_space<vmem>>, vector<32x4xf32>
    %c0_4 = arith.constant 0 : index
    %c0_5 = arith.constant 0 : index
    %3 = vector.load %arg5[%c0_4, %c0_5] : memref<32x1xf32, #tpu.memory_space<vmem>>, vector<32x1xf32>
    %4 = vector.extract_strided_slice %2 {offsets = [0, 0], sizes = [32, 1], strides = [1, 1]} : vector<32x4xf32> to vector<32x1xf32>
    %5 = vector.extract_strided_slice %1 {offsets = [0, 0], sizes = [1, 256], strides = [1, 1]} : vector<4x256xf32> to vector<1x256xf32>
    %6 = vector.broadcast %4 : vector<32x1xf32> to vector<32x256xf32>
    %7 = vector.broadcast %5 : vector<1x256xf32> to vector<32x256xf32>
    %8 = arith.mulf %6, %7 : vector<32x256xf32>
    %9 = vector.broadcast %3 : vector<32x1xf32> to vector<32x256xf32>
    %10 = arith.addf %8, %9 : vector<32x256xf32>
    %11 = vector.extract_strided_slice %2 {offsets = [0, 1], sizes = [32, 1], strides = [1, 1]} : vector<32x4xf32> to vector<32x1xf32>
    %12 = vector.extract_strided_slice %1 {offsets = [1, 0], sizes = [1, 256], strides = [1, 1]} : vector<4x256xf32> to vector<1x256xf32>
    %13 = vector.broadcast %11 : vector<32x1xf32> to vector<32x256xf32>
    %14 = vector.broadcast %12 : vector<1x256xf32> to vector<32x256xf32>
    %15 = arith.mulf %13, %14 : vector<32x256xf32>
    %16 = arith.addf %10, %15 : vector<32x256xf32>
    %17 = vector.extract_strided_slice %2 {offsets = [0, 2], sizes = [32, 1], strides = [1, 1]} : vector<32x4xf32> to vector<32x1xf32>
    %18 = vector.extract_strided_slice %1 {offsets = [2, 0], sizes = [1, 256], strides = [1, 1]} : vector<4x256xf32> to vector<1x256xf32>
    %19 = vector.broadcast %17 : vector<32x1xf32> to vector<32x256xf32>
    %20 = vector.broadcast %18 : vector<1x256xf32> to vector<32x256xf32>
    %21 = arith.mulf %19, %20 : vector<32x256xf32>
    %22 = arith.addf %16, %21 : vector<32x256xf32>
    %23 = vector.extract_strided_slice %2 {offsets = [0, 3], sizes = [32, 1], strides = [1, 1]} : vector<32x4xf32> to vector<32x1xf32>
    %24 = vector.extract_strided_slice %1 {offsets = [3, 0], sizes = [1, 256], strides = [1, 1]} : vector<4x256xf32> to vector<1x256xf32>
    %25 = vector.broadcast %23 : vector<32x1xf32> to vector<32x256xf32>
    %26 = vector.broadcast %24 : vector<1x256xf32> to vector<32x256xf32>
    %27 = arith.mulf %25, %26 : vector<32x256xf32>
    %28 = arith.addf %22, %27 : vector<32x256xf32>
    %cst = arith.constant 0.00999999977 : f32
    %29 = vector.broadcast %cst : f32 to vector<32x256xf32>
    %30 = arith.mulf %29, %28 : vector<32x256xf32>
    %31 = arith.maximumf %28, %30 : vector<32x256xf32>
    %c0_6 = arith.constant 0 : index
    %c0_7 = arith.constant 0 : index
    %c0_8 = arith.constant 0 : index
    %32 = vector.load %arg6[%c0_6, %c0_7, %c0_8] : memref<1x32x256xf32, #tpu.memory_space<vmem>>, vector<1x32x256xf32>
    %33 = vector.shape_cast %32 : vector<1x32x256xf32> to vector<32x256xf32>
    %34 = vector.shape_cast %31 : vector<32x256xf32> to vector<1x32x256xf32>
    tpu.vector_store %arg6[%c0_6, %c0_7, %c0_8], %34 {strides = array<i32>} : memref<1x32x256xf32, #tpu.memory_space<vmem>>, vector<1x32x256xf32>,
    return
  }
  func.func @transform_0(%arg0: i32, %arg1: i32, %arg2: i32) -> (i32, i32, i32) {
    %c0_i32 = arith.constant 0 : i32
    %c0_i32_0 = arith.constant 0 : i32
    return %arg0, %c0_i32, %arg2 : i32, i32, i32
  }
  func.func @transform_1(%arg0: i32, %arg1: i32, %arg2: i32) -> (i32, i32) {
    %c0_i32 = arith.constant 0 : i32
    %c0_i32_0 = arith.constant 0 : i32
    return %arg1, %c0_i32 : i32, i32
  }
  func.func @transform_2(%arg0: i32, %arg1: i32, %arg2: i32) -> (i32, i32) {
    %c0_i32 = arith.constant 0 : i32
    %c0_i32_0 = arith.constant 0 : i32
    return %arg1, %c0_i32 : i32, i32
  }
  func.func @transform_3(%arg0: i32, %arg1: i32, %arg2: i32) -> (i32, i32, i32) {
    %c0_i32 = arith.constant 0 : i32
    return %arg0, %arg1, %arg2 : i32, i32, i32
  }
}

</mosaic_0001>

<bundles_post_ra>
// kernel: tpu_custom_call.1
= control target key start
LH: loop header
LB: loop body
LE: loop exit
PB: predicated region body
PF: predicated region fallthrough
CT: control target
= control target key end

     0   :  { %8 = vsyncpa [#allocation3], 0  ;;  %s959_s0 = inlined_call_operand.vmem [shape: f32[2,4,256], index: 0, kind: input, shape index: {}]   ;;  %s960_s1 = inlined_call_operand.vmem [shape: f32[32,4], index: 1, kind: input, shape index: {}]   ;;  %s961_s2 = inlined_call_operand.vmem [shape: f32[32,1], index: 2, kind: input, shape index: {}]   ;;  %s962_s3 = inlined_call_operand.hbm [shape: f32[2,32,256], index: 3, kind: output, shape index: {}]  }
   0x1   :  { %10 = vsyncpa [#allocation3 + $0x1], 0  ;;  %s795_s12 = smov 0   ;;  %s797_s13 = smov 0  }
   0x2   :  { %s799_s14 = smov 0   ;;  %s801_s15 = smov 0  }
   0x3   :  { %s803_s16 = smov 0   ;;  %s805_s17 = smov 0  }
   0x4 LB: > { %s599_s18 = sadd.s32 4294967295, %s767_s17   ;;  %s600_s19 = sadd.s32 4294967294, %s767_s17   ;;  %s767_s17 = sphi %s805_s17, %s16_s17   ;;  %s763_s16 = sphi %s803_s16, %s969_s16   ;;  %s759_s15 = sphi %s801_s15, %s968_s15   ;;  %s755_s14 = sphi %s799_s14, %s967_s14   ;;  %s751_s13 = sphi %s797_s13, %s966_s13   ;;  %s747_s12 = sphi %s795_s12, %s965_s12  }
   0x5   : > { %s35_s20 = sadd.s32 1, %s763_s16  ;;  %s126_s21 = sadd.s32 1, %s755_s14 }
   0x6   : > { %p37_p0 = scmp.ge.s32.totalorder %s35_s20, 2  ;;  %p136_p1 = scmp.ne.s32.totalorder %s755_s14, %s751_s13 }
   0x7   : > { %p137_p2 = scmp.eq.s32.totalorder %s599_s18, 1  ;;  %p142_p3 = scmp.ne.s32.totalorder %s751_s13, %s747_s12 }
   0x8   : > { %s971_s20 = smov (%p37_p0, %s35_s20), 0  ;;  %p143_p5 = scmp.eq.s32.totalorder %s600_s19, 1 }
   0x9   : > { %p835_p4 = por %p137_p2, %p136_p1  ;;  %s119_s23 = ssub.s32 %s763_s16, %s971_s20 }
   0xa   : > { %p605_p6 = scmp.ge.s32.totalorder %s767_s17, 1  ;;  %p124_p7 = scmp.eq.s32.totalorder %s119_s23, 0 }
   0xb   : > { %p842_p8 = por %p143_p5, %p142_p3  ;;  %p192_p9 = scmp.lt.s32.totalorder %s767_s17, 3 }
   0xc   : > { %s848_s25 = scalar_select %p124_p7, %s755_s14, %s126_s21  }
   0xd   : > { %p193_p10 = pnand %p605_p6, %p192_p9 }
   0xe   : > { %p231_p11 = scmp.lt.s32.totalorder (!%p193_p10), %s759_s15, 1  ;;  %s227_s30 = sand.u32 (!%p193_p10), 1, %s751_s13  }
   0xf   : > { %196 = sbr.rel (%p193_p10) target bundleno = 201 (0xc9), region = 32  ;;  %s606_s4 = sshll.u32 (!%p193_p10), %s227_s30, 6 }
  0x10   : > { %s905_s5 = scalar_lea.vmem (!%p193_p10), [#allocation2], %s606_s4  ;;  %s615_s6 = sshll.u32 (!%p193_p10), %s759_s15, 6 }
  0x11   : > { %s481_s9 = scalar_lea.hbm (!%p193_p10), %s962_s3, %s615_s6  ;;  %s465_s11 = scalar_lea.sflag (!%p193_p10), [#allocation3], %s227_s30 }
  0x12   : > { %s484_s10 = sshll.u32 (!%p193_p10), %s481_s9, 4  ;;  %s485_s10 = int_to_ptr.hbm [resolvable:$true] %s484_s10 }
  0x13   : > { %s703_s18 = sshra.s32 (!%p193_p10), %s485_s10, 4  ;;  %s704_s18 = int_to_ptr.hbm [resolvable:$true] %s703_s18 }
  0x14   : > { %v257_v0 = vld [vmem:[%s960_s1 + $0x10] sm:$0xff]  ;;  %v255_v1 = vld [vmem:[%s960_s1] sm:$0xff]  ;;  %v769_v2 = vmov 0   ;;  %v258_v4 = vld [vmem:[%s960_s1 + $0x18] sm:$0xff]  ;;  %v770_v9 = vmov 1   ;;  %v771_v10 = vmov 2   ;;  %p710_p1 = scmp.lt.s32.totalorder %s704_s18, %s962_s3 }
  0x15   : > { %678 = vset.pattern.permute.xlu1 %v769_v2  ;;  %677 = vset.pattern.permute.xlu0 %v769_v2  ;;  %v259_v3 = vld [vmem:[%s961_s2] sm:$0xff]  ;;  %v256_v5 = vld [vmem:[%s960_s1 + $0x8] sm:$0xff]  ;;  %v262_v7 = vld [vmem:[%s961_s2 + $0x18] sm:$0xff]  ;;  %v772_v11 = vmov 3   ;;  %s232_s23 = scalar_select %p231_p11, %s759_s15, 1 }
  0x16   : > { %275 = vperm.xlu1 %678, %v257_v0   ;;  %265 = vperm.xlu0 %677, %v255_v1   ;;  %v260_v6 = vld [vmem:[%s961_s2 + $0x8] sm:$0xff]  ;;  %v261_v8 = vld [vmem:[%s961_s2 + $0x10] sm:$0xff]  ;;  %s482_s15 = sshll.u32 %s905_s5, 4  ;;  %s705_s19 = scalar_lea.hbm %s704_s18, 64  ;;  %s483_s15 = int_to_ptr.vmem [resolvable:$true] %s482_s15 }
  0x17   : > { %679 = vset.pattern.permute.xlu2 %v769_v2  ;;  %s614_s26 = sshll.u32 %s232_s23, 3  ;;  %p706_p12 = scmp.ne.s32.totalorder %s704_s18, %s705_s19 }
  0x18   : > { %300 = vperm.xlu2 %679, %v259_v3   ;;  %s238_s29 = scalar_lea.vmem %s959_s0, %s614_s26  ;;  %s709_s26 = scalar_lea.hbm %s962_s3, 128 }
  0x19   : > { %v254_v21 = vld [vmem:[%s238_s29] sm:$0xff]  ;;  %p707_p13 = pnand %p706_p12, %p835_p4  ;;  %p711_p2 = scmp.lt.s32.totalorder %s709_s26, %s705_s19 }
  0x1a   : > { %v284_v22 = vperm.slane %v254_v21, 0  ;;  %v285_v25 = vperm.slane %v254_v21, 4  ;;  %v342_v27 = vperm.slane %v254_v21, 1  ;;  %v343_v29 = vperm.slane %v254_v21, 5 }
  0x1b   : > { %v418_v37 = vperm.slane %v254_v21, 3  ;;  %v419_v38 = vperm.slane %v254_v21, 7  ;;  %v380_v39 = vperm.slane %v254_v21, 2  ;;  %v381_v42 = vperm.slane %v254_v21, 6  ;;  %p708_p0 = pneg %p707_p13  ;;  %p712_p3 = por %p711_p2, %p710_p1 }
  0x1c   : > { %v288_v26 = vperm.slane %v284_v22, 0  ;;  %v289_v28 = vperm.slane %v285_v25, 0  ;;  %v346_v32 = vperm.slane %v342_v27, 1  ;;  %v347_v34 = vperm.slane %v343_v29, 1 }
  0x1d   : > { %v887_v45 = vperm.slane %v418_v37, 3  ;;  %v889_v46 = vperm.slane %v419_v38, 3  ;;  %v384_v51 = vperm.slane %v380_v39, 2  ;;  %v385_v56 = vperm.slane %v381_v42, 2  ;;  %p713_p5 = pnand %p712_p3, %p708_p0 }
  0x1e   : > { %280 = vperm.xlu1 %678, %v258_v4   ;;  %270 = vperm.xlu0 %677, %v256_v5  }
  0x20   : > { %305 = vperm.xlu2 %679, %v260_v6  }
  0x26   : > { %315 = vperm.xlu1 %678, %v262_v7   ;;  %310 = vperm.xlu0 %677, %v261_v8  }
  0x28   : > { %680 = vset.pattern.permute.xlu2 %v770_v9 }
  0x29   : > { %327 = vperm.xlu2 %680, %v255_v1  }
  0x2e   : > { %682 = vset.pattern.permute.xlu1 %v770_v9  ;;  %681 = vset.pattern.permute.xlu0 %v770_v9 }
  0x2f   : > { %335 = vperm.xlu1 %682, %v257_v0   ;;  %331 = vperm.xlu0 %681, %v256_v5  }
  0x31   : > { %339 = vperm.xlu2 %680, %v258_v4  }
  0x37   : > { %683 = vset.pattern.permute.xlu1 %v771_v10  ;;  %685 = vset.pattern.permute.xlu0 %v771_v10 }
  0x38   : > { %365 = vperm.xlu1 %683, %v255_v1   ;;  %373 = vperm.xlu0 %685, %v257_v0  }
  0x39   : > { %684 = vset.pattern.permute.xlu2 %v771_v10 }
  0x3a   : > { %369 = vperm.xlu2 %684, %v256_v5  }
  0x40   : > { %377 = vperm.xlu1 %683, %v258_v4   ;;  %688 = vset.pattern.permute.xlu0 %v772_v11 }
  0x41   : > { %415 = vperm.xlu0 %688, %v258_v4  }
  0x42   : > { %686 = vset.pattern.permute.xlu2 %v772_v11 }
  0x43   : > { %403 = vperm.xlu2 %686, %v255_v1  }
  0x48   : > { %687 = vset.pattern.permute.xlu1 %v772_v11 }
  0x49   : > { %407 = vperm.xlu1 %687, %v256_v5  }
  0x4b   : > { %411 = vperm.xlu2 %686, %v257_v0  }
  0x72   : > { %v301_v12 = vpop.permute.xlu2 %300 }
  0x7a   : > { %v874_v13 = vpop.permute.xlu2 %305 }
  0x83   : > { %v328_v14 = vpop.permute.xlu2 %327 }
  0x84   : > { %v348_v41 = vmul.f32 %v346_v32, %v328_v14  ;;  %v349_v44 = vmul.f32 %v347_v34, %v328_v14 }
  0x88   : > { %v276_v15 = vpop.permute.xlu1 %275  ;;  %v266_v16 = vpop.permute.xlu0 %265 }
  0x89   : > { %v290_v31 = vmul.f32 %v288_v26, %v266_v16  ;;  %v291_v33 = vmul.f32 %v289_v28, %v266_v16  ;;  %v294_v47 = vmul.f32 %v288_v26, %v276_v15  ;;  %v295_v48 = vmul.f32 %v289_v28, %v276_v15 }
  0x8b   : > { %v878_v17 = vpop.permute.xlu2 %339  ;;  %v318_v40 = vadd.f32 %v301_v12, %v290_v31  ;;  %v319_v43 = vadd.f32 %v301_v12, %v291_v33 }
  0x8c   : > { %v354_v8 = vmul.f32 %v346_v32, %v878_v17  ;;  %v355_v15 = vmul.f32 %v347_v34, %v878_v17 }
  0x8d   : > { %v356_v53 = vadd.f32 %v348_v41, %v318_v40  ;;  %v357_v57 = vadd.f32 %v349_v44, %v319_v43 }
  0x90   : > { %v281_v18 = vpop.permute.xlu1 %280  ;;  %v880_v19 = vpop.permute.xlu0 %270 }
  0x91   : > { %v296_v58 = vmul.f32 %v288_v26, %v281_v18  ;;  %v297_v7 = vmul.f32 %v289_v28, %v281_v18  ;;  %v292_v27 = vmul.f32 %v288_v26, %v880_v19  ;;  %v293_v18 = vmul.f32 %v289_v28, %v880_v19 }
  0x93   : > { %v320_v28 = vadd.f32 %v874_v13, %v292_v27 }
  0x94   : > { %v885_v20 = vpop.permute.xlu2 %369 }
  0x98   : > { %v316_v23 = vpop.permute.xlu1 %315  ;;  %v311_v24 = vpop.permute.xlu0 %310 }
  0x99   : > { %v322_v54 = vadd.f32 %v311_v24, %v294_v47  ;;  %v323_v55 = vadd.f32 %v311_v24, %v295_v48  ;;  %v324_v9 = vadd.f32 %v316_v23, %v296_v58  ;;  %v325_v16 = vadd.f32 %v316_v23, %v297_v7 }
  0x9a   : > { %v388_v48 = vmul.f32 %v384_v51, %v885_v20 }
  0x9b   : > { %v362_v29 = vadd.f32 %v354_v8, %v324_v9 }
  0x9d   : > { %v404_v30 = vpop.permute.xlu2 %403 }
  0x9e   : > { %v424_v59 = vmul.f32 %v887_v45, %v404_v30  ;;  %v425_v60 = vmul.f32 %v889_v46, %v404_v30 }
  0xa1   : > { %v336_v35 = vpop.permute.xlu1 %335  ;;  %v332_v36 = vpop.permute.xlu0 %331 }
  0xa2   : > { %v352_v49 = vmul.f32 %v346_v32, %v336_v35  ;;  %v353_v50 = vmul.f32 %v347_v34, %v336_v35  ;;  %v363_v35 = vadd.f32 %v355_v15, %v325_v16  ;;  %v350_v37 = vmul.f32 %v346_v32, %v332_v36 }
  0xa3   : > { %v351_v38 = vmul.f32 %v347_v34, %v332_v36  ;;  %v321_v34 = vadd.f32 %v874_v13, %v293_v18 }
  0xa4   : > { %v360_v61 = vadd.f32 %v352_v49, %v322_v54  ;;  %v361_v62 = vadd.f32 %v353_v50, %v323_v55  ;;  %v358_v49 = vadd.f32 %v350_v37, %v320_v28 }
  0xa5   : > { %v412_v52 = vpop.permute.xlu2 %411 }
  0xa6   : > { %v428_v1 = vmul.f32 %v887_v45, %v412_v52  ;;  %v429_v2 = vmul.f32 %v889_v46, %v412_v52  ;;  %v389_v52 = vmul.f32 %v385_v56, %v885_v20 }
  0xaa   : > { %v366_v63 = vpop.permute.xlu1 %365  ;;  %v374_v0 = vpop.permute.xlu0 %373 }
  0xab   : > { %v386_v3 = vmul.f32 %v384_v51, %v366_v63  ;;  %v387_v4 = vmul.f32 %v385_v56, %v366_v63  ;;  %v390_v5 = vmul.f32 %v384_v51, %v374_v0  ;;  %v391_v6 = vmul.f32 %v385_v56, %v374_v0 }
  0xad   : > { %v394_v10 = vadd.f32 %v386_v3, %v356_v53  ;;  %v395_v11 = vadd.f32 %v387_v4, %v357_v57  ;;  %v398_v12 = vadd.f32 %v390_v5, %v360_v61  ;;  %v399_v14 = vadd.f32 %v391_v6, %v361_v62 }
  0xae   : > { %v359_v53 = vadd.f32 %v351_v38, %v321_v34 }
  0xaf   : > { %v432_v21 = vadd.f32 %v424_v59, %v394_v10  ;;  %v433_v22 = vadd.f32 %v425_v60, %v395_v11  ;;  %v436_v24 = vadd.f32 %v428_v1, %v398_v12  ;;  %v437_v25 = vadd.f32 %v429_v2, %v399_v14 }
  0xb0   : > { %v396_v59 = vadd.f32 %v388_v48, %v358_v49  ;;  %v397_v61 = vadd.f32 %v389_v52, %v359_v53 }
  0xb1   : > { %v440_v30 = vmul.f32 0.01, %v432_v21  ;;  %v441_v31 = vmul.f32 0.01, %v433_v22  ;;  %v444_v33 = vmul.f32 0.01, %v436_v24 }
  0xb2   : > { %v445_v39 = vmul.f32 0.01, %v437_v25  ;;  %v378_v17 = vpop.permute.xlu1 %377 }
  0xb3   : > { %v448_v23 = vmax.f32 %v432_v21, %v440_v30  ;;  %v449_v40 = vmax.f32 %v433_v22, %v441_v31  ;;  %v452_v41 = vmax.f32 %v436_v24, %v444_v33  ;;  %v392_v42 = vmul.f32 %v384_v51, %v378_v17  ;;  %v416_v43 = vpop.permute.xlu0 %415 }
  0xb4   : > { %v453_v44 = vmax.f32 %v437_v25, %v445_v39  ;;  %v393_v47 = vmul.f32 %v385_v56, %v378_v17  ;;  %v430_v26 = vmul.f32 %v887_v45, %v416_v43  ;;  %v431_v19 = vmul.f32 %v889_v46, %v416_v43 }
  0xb5   : > { %456 = vst [vmem:[%s905_s5] sm:$0xff] %v448_v23  ;;  %v400_v32 = vadd.f32 %v392_v42, %v362_v29 }
  0xb6   : > { %457 = vst [vmem:[%s905_s5 + $0x8] sm:$0xff] %v449_v40  ;;  %v401_v36 = vadd.f32 %v393_v47, %v363_v35 }
  0xb7   : > { %460 = vst [vmem:[%s905_s5 + $0x20] sm:$0xff] %v452_v41  ;;  %v438_v50 = vadd.f32 %v430_v26, %v400_v32 }
  0xb8   : > { %461 = vst [vmem:[%s905_s5 + $0x28] sm:$0xff] %v453_v44  ;;  %v439_v54 = vadd.f32 %v431_v19, %v401_v36 }
  0xb9   : > { %v446_v55 = vmul.f32 0.01, %v438_v50 }
  0xba   : > { %v447_v57 = vmul.f32 0.01, %v439_v54 }
  0xbb   : > { %v454_v58 = vmax.f32 %v438_v50, %v446_v55  ;;  %v408_v13 = vpop.permute.xlu1 %407 }
  0xbc   : > { %v455_v60 = vmax.f32 %v439_v54, %v447_v57  ;;  %v426_v51 = vmul.f32 %v887_v45, %v408_v13  ;;  %v427_v62 = vmul.f32 %v889_v46, %v408_v13 }
  0xbd   : > { %462 = vst [vmem:[%s905_s5 + $0x30] sm:$0xff] %v454_v58 }
  0xbe   : > { %463 = vst [vmem:[%s905_s5 + $0x38] sm:$0xff] %v455_v60  ;;  %v434_v20 = vadd.f32 %v426_v51, %v396_v59  ;;  %v435_v56 = vadd.f32 %v427_v62, %v397_v61 }
  0xc0   : > { %v442_v63 = vmul.f32 0.01, %v434_v20  ;;  %v443_v0 = vmul.f32 0.01, %v435_v56 }
  0xc2   : > { %v450_v1 = vmax.f32 %v434_v20, %v442_v63  ;;  %v451_v2 = vmax.f32 %v435_v56, %v443_v0 }
  0xc4   : > { %458 = vst [vmem:[%s905_s5 + $0x10] sm:$0xff] %v450_v1 }
  0xc5   : > { %459 = vst [vmem:[%s905_s5 + $0x18] sm:$0xff] %v451_v2 }
  0xc6   : > { %716 = shalt.err (!%p713_p5)
}
  0xc7   : > { %s773_s29 = smov 256   ;;  %s774_s30 = smov 16  }
  0xc8   : > { %616 = dma.vmem_to_hbm [thread:$0]  (%p835_p4), %s483_s15, 1024, %s485_s10, %s465_s11, %s773_s29, %s773_s29, %s774_s30  }
  0xc9 PF: > { %p622_p6 = scmp.ge.s32.totalorder %s767_s17, 2  ;;  %s499_s4 = sand.u32 1, %s747_s12  }
  0xca   : > { %s500_s5 = scalar_lea.sflag [#allocation3], %s499_s4 }
  0xcb   : > { %p619_p7 = pnand %p622_p6, %p842_p8 }
  0xcd   : > { %p620_p9 = pneg %p619_p7 }
  0xcf   : > { %742 = dma.done.wait (%p620_p9), %s500_s5, 1024  }
  0xd0   : > { %744 = vsyncadd (%p620_p9), %s500_s5, 4294966272  ;;  %s16_s17 = sadd.s32 1, %s767_s17   ;;  %s965_s12 = smov %s751_s13 }
  0xd1   : > { %p13_p10 = scmp.ge.s32.totalorder %s16_s17, 4   ;;  %s966_s13 = smov %s755_s14 }
  0xd2   : > { %s967_s14 = smov %s848_s25  ;;  %s968_s15 = smov %s763_s16 }
  0xd3   : > { %s969_s16 = smov %s971_s20  ;;  %15 = sbr.rel (!%p13_p10) target bundleno = 4 (0x4), region = 73 }
  0xd8   :  { %506 = vsyncpa [#allocation3], 1 }
  0xd9   :  { %508 = vsyncpa [#allocation3 + $0x1], 1 }

</bundles_post_ra>
